<compile_context>
chip_gen: v7x
topology: tpu7x:2x2x1
jax: 0.10.0
libtpu: 0.0.40
codegen_flags: <defaults>
</compile_context>

<pallas_src>
import jax
import jax.numpy as jnp
from jax import lax
from jax.experimental import pallas as pl
from jax.experimental.pallas import tpu as pltpu


def _round_up(x, m):
    return ((x + m - 1) // m) * m


def _cdiv(a, b):
    return (a + b - 1) // b


def fuse_embedding_tables(row_tab, col_tab, dir_tab):
    """Module-init-time fusion of the three embedding tables.

    Returns the fused lane-dense table (in_sz, round_up(2L+dir_dim, 128)) and
    (length, dir_dim).  Hoisted out of the per-call path per the perf review.
    """
    in_sz, length = row_tab.shape
    dir_dim = dir_tab.shape[1]
    out_w = 2 * length + dir_dim
    out_pad = _round_up(out_w, 128)
    fused = jnp.concatenate([row_tab, col_tab, dir_tab], axis=1).astype(jnp.float32)
    fused = jnp.pad(fused, ((0, 0), (0, out_pad - out_w)))
    return fused, (length, dir_dim)


def _vector_decoder_kernel(idx_ref, tab_ref, out_ref):
    # idx_ref: (TN, 1) int32; tab_ref: (in_sz, OUT_PAD) f32; out_ref: (TN, OUT_PAD) f32
    idx = idx_ref[...]                                    # (TN, 1)
    tn = idx.shape[0]
    in_sz = tab_ref.shape[0]
    # one-hot(TN, in_sz) via iota compare -> the gather becomes one MXU matmul
    iota = lax.broadcasted_iota(jnp.int32, (tn, in_sz), 1)
    onehot = (idx == iota).astype(jnp.float32)            # (TN, in_sz)
    # single lane-dense matmul + unmasked (TN, OUT_PAD) store
    out_ref[...] = jnp.dot(onehot, tab_ref[...],
                           preferred_element_type=jnp.float32)


def _make_call(n_pad, tn, in_sz, out_pad, vmem_limit, single_buffer_table):
    if single_buffer_table:
        # Constant index_map -> never re-DMA'd; one VMEM buffer is enough.
        table_spec = pl.BlockSpec((in_sz, out_pad), lambda i: (0, 0),
                                  pipeline_mode=pl.Buffered(1))
    else:
        table_spec = pl.BlockSpec((in_sz, out_pad), lambda i: (0, 0))

    return pl.pallas_call(
        _vector_decoder_kernel,
        out_shape=jax.ShapeDtypeStruct((n_pad, out_pad), jnp.float32),
        grid_spec=pltpu.PrefetchScalarGridSpec(
            num_scalar_prefetch=0,
            grid=(n_pad // tn,),
            in_specs=[
                pl.BlockSpec((tn, 1), lambda i: (i, 0)),   # index tile
                table_spec,                                # resident fused table
            ],
            out_specs=pl.BlockSpec((tn, out_pad), lambda i: (i, 0)),
        ),
        compiler_params=pltpu.CompilerParams(
            dimension_semantics=("parallel",),
            vmem_limit_bytes=vmem_limit),
        cost_estimate=pl.CostEstimate(
            flops=2 * n_pad * in_sz * out_pad,
            transcendentals=0,
            bytes_accessed=(n_pad * 4                 # indices
                            + in_sz * out_pad * 4     # table (read once)
                            + n_pad * out_pad * 4)),  # output
    )


def vector_decoder(indices, fused_table, length, dir_dim, *, max_tile_n=1024):
    """indices: int array of arbitrary shape, values in [0, in_sz).

    fused_table: output of fuse_embedding_tables (precomputed at init).
    Returns (row, col, dir) with shapes (*indices.shape, length) x2 and
    (*indices.shape, dir_dim).  Out-of-range indices yield all-zero rows
    (PyTorch nn.Embedding would raise); padded tail indices (value 0) do real
    lookups that are sliced off afterwards -- harmless.
    """
    in_sz, out_pad = fused_table.shape
    out_w = 2 * length + dir_dim

    batch_shape = indices.shape
    idx = indices.reshape(-1).astype(jnp.int32)
    n = idx.shape[0]

    if n == 0:  # empty-input guard
        return (jnp.zeros((*batch_shape, length), jnp.float32),
                jnp.zeros((*batch_shape, length), jnp.float32),
                jnp.zeros((*batch_shape, dir_dim), jnp.float32))

    # --- tile / grid selection --------------------------------------------
    max_tile_n = max(8, (max_tile_n // 8) * 8)   # clamp to a multiple of 8
    n8 = _round_up(n, 8)
    steps = max(_cdiv(n8, max_tile_n), 1)
    if n8 > 8:
        # >= 2 (and even) steps so the "parallel" grid axis can shard across
        # v7x's two TensorCores; trivial extra padding at most one tile.
        steps = max(steps, 2)
        if steps % 2:
            steps += 1
    tn = _round_up(_cdiv(n8, steps), 8)          # multiple of 8 (sublane rule)
    n_pad = tn * steps                           # grid divides n_pad exactly

    idx2d = jnp.pad(idx, (0, n_pad - n)).reshape(n_pad, 1)

    # --- explicit VMEM budget (v5e default scoped limit is only 16 MiB) ----
    table_bytes = in_sz * out_pad * 4            # single-buffered resident table
    tile_bytes = (2 * tn * 128 * 4               # idx tiles (lane-padded), x2 bufs
                  + 2 * tn * out_pad * 4         # output tiles, x2 bufs
                  + tn * in_sz * 4)              # one-hot working set
    vmem_limit = int(min(max(table_bytes + tile_bytes + (8 << 20), 32 << 20),
                         64 << 20))              # never exceed v7x physical/TC

    try:
        out = _make_call(n_pad, tn, in_sz, out_pad, vmem_limit,
                         single_buffer_table=True)(idx2d, fused_table)
    except Exception:
        # Fallback if this JAX/Mosaic version rejects pipeline_mode=Buffered(1).
        out = _make_call(n_pad, tn, in_sz, out_pad, vmem_limit,
                         single_buffer_table=False)(idx2d, fused_table)

    out = out[:n, :out_w]
    row = out[:, :length].reshape(*batch_shape, length)
    col = out[:, length:2 * length].reshape(*batch_shape, length)
    direc = out[:, 2 * length:out_w].reshape(*batch_shape, dir_dim)
    return row, col, direc


if __name__ == "__main__":
    # Module hyperparameters (small, consistent with the forward pass)
    length = 16     # embedding_dim of row_dec / col_dec
    in_sz = 32      # num_embeddings (vocabulary size)
    B, S = 2, 8     # batch, sequence of integer tokens

    key = jax.random.PRNGKey(0)
    k_idx, k_row, k_col, k_dir = jax.random.split(key, 4)

    # Deterministic parameter init (nn.Embedding default ~ N(0, 1))
    row_tab = jax.random.normal(k_row, (in_sz, length), dtype=jnp.float32)
    col_tab = jax.random.normal(k_col, (in_sz, length), dtype=jnp.float32)
    dir_tab = jax.random.normal(k_dir, (in_sz, 2), dtype=jnp.float32)

    # Integer token input (PyTorch would use int64; int32 is TPU-native)
    indices = jax.random.randint(k_idx, (B, S), 0, in_sz, dtype=jnp.int32)

    # "Module init": fuse the three tables once, outside the per-call path.
    fused, (length_, dir_dim) = fuse_embedding_tables(row_tab, col_tab, dir_tab)
    fused = jax.block_until_ready(fused)

    row, col, direc = vector_decoder(indices, fused, length_, dir_dim)
    jax.block_until_ready((row, col, direc))

    # Reference: plain embedding lookup
    row_ref = jnp.take(row_tab, indices, axis=0)
    col_ref = jnp.take(col_tab, indices, axis=0)
    dir_ref = jnp.take(dir_tab, indices, axis=0)

    assert row.shape == (B, S, length)
    assert col.shape == (B, S, length)
    assert direc.shape == (B, S, 2)
    assert jnp.allclose(row, row_ref, atol=1e-6)
    assert jnp.allclose(col, col_ref, atol=1e-6)
    assert jnp.allclose(direc, dir_ref, atol=1e-6)

    print("KERNEL_OK")
</pallas_src>

<mosaic_0001>
module attributes {stable_mosaic.version = 11 : i64} {
  func.func @_vector_decoder_kernel(%arg0: i32, %arg1: memref<8x1xi32, #tpu.memory_space<vmem>>, %arg2: memref<32x128xf32, #tpu.memory_space<vmem>>, %arg3: memref<8x128xf32, #tpu.memory_space<vmem>>) attributes {dimension_semantics = [#tpu.dimension_semantics<parallel>], iteration_bounds = array<i64: 2>, scalar_prefetch = 0 : i64, scratch_operands = 0 : i64, tpu.core_type = #tpu.core_type<tc>, window_params = [{transform_indices = @transform_0, window_bounds = array<i64: 8, 1>}, {pipeline_mode = #tpu.pipeline_mode<synchronous>, transform_indices = @transform_1, window_bounds = array<i64: 32, 128>}, {transform_indices = @transform_2, window_bounds = array<i64: 8, 128>}]} {
    %c0 = arith.constant 0 : index
    %c0_0 = arith.constant 0 : index
    %0 = vector.load %arg1[%c0, %c0_0] : memref<8x1xi32, #tpu.memory_space<vmem>>, vector<8x1xi32>
    %1 = tpu.iota {dimensions = array<i32: 1>} : vector<8x32xi32>
    %2 = vector.broadcast %0 : vector<8x1xi32> to vector<8x32xi32>
    %3 = arith.cmpi eq, %2, %1 : vector<8x32xi32>
    %4 = arith.extui %3 : vector<8x32xi1> to vector<8x32xi32>
    %5 = arith.sitofp %4 : vector<8x32xi32> to vector<8x32xf32>
    %c0_1 = arith.constant 0 : index
    %c0_2 = arith.constant 0 : index
    %6 = vector.load %arg2[%c0_1, %c0_2] : memref<32x128xf32, #tpu.memory_space<vmem>>, vector<32x128xf32>
    %cst = arith.constant dense<0.000000e+00> : vector<8x128xf32>
    %7 = tpu.matmul %5, %6, %cst {dimension_numbers = #tpu.dot_dimension_numbers<[1], [0], [0], [1], [0, 0, 1, 1], [], []>} : vector<8x32xf32>, vector<32x128xf32>, vector<8x128xf32> -> vector<8x128xf32>
    %c0_3 = arith.constant 0 : index
    %c0_4 = arith.constant 0 : index
    %8 = vector.load %arg3[%c0_3, %c0_4] : memref<8x128xf32, #tpu.memory_space<vmem>>, vector<8x128xf32>
    tpu.vector_store %arg3[%c0_3, %c0_4], %7 {strides = array<i32>} : memref<8x128xf32, #tpu.memory_space<vmem>>, vector<8x128xf32>,
    return
  }
  func.func @transform_0(%arg0: i32) -> (i32, i32) {
    %c0_i32 = arith.constant 0 : i32
    %c0_i32_0 = arith.constant 0 : i32
    return %arg0, %c0_i32 : i32, i32
  }
  func.func @transform_1(%arg0: i32) -> (i32, i32) {
    %c0_i32 = arith.constant 0 : i32
    %c0_i32_0 = arith.constant 0 : i32
    %c0_i32_1 = arith.constant 0 : i32
    return %c0_i32, %c0_i32_0 : i32, i32
  }
  func.func @transform_2(%arg0: i32) -> (i32, i32) {
    %c0_i32 = arith.constant 0 : i32
    %c0_i32_0 = arith.constant 0 : i32
    return %arg0, %c0_i32 : i32, i32
  }
}

module attributes {stable_mosaic.version = 11 : i64} {
  func.func @_vector_decoder_kernel(%arg0: i32, %arg1: memref<8x1xi32, #tpu.memory_space<vmem>>, %arg2: memref<32x128xf32, #tpu.memory_space<vmem>>, %arg3: memref<8x128xf32, #tpu.memory_space<vmem>>) attributes {dimension_semantics = [#tpu.dimension_semantics<parallel>], iteration_bounds = array<i64: 2>, scalar_prefetch = 0 : i64, scratch_operands = 0 : i64, tpu.core_type = #tpu.core_type<tc>, window_params = [{transform_indices = @transform_0, window_bounds = array<i64: 8, 1>}, {pipeline_mode = #tpu.pipeline_mode<synchronous>, transform_indices = @transform_1, window_bounds = array<i64: 32, 128>}, {transform_indices = @transform_2, window_bounds = array<i64: 8, 128>}]} {
    %c0 = arith.constant 0 : index
    %c0_0 = arith.constant 0 : index
    %0 = vector.load %arg1[%c0, %c0_0] : memref<8x1xi32, #tpu.memory_space<vmem>>, vector<8x1xi32>
    %1 = tpu.iota {dimensions = array<i32: 1>} : vector<8x32xi32>
    %2 = vector.broadcast %0 : vector<8x1xi32> to vector<8x32xi32>
    %3 = arith.cmpi eq, %2, %1 : vector<8x32xi32>
    %4 = arith.extui %3 : vector<8x32xi1> to vector<8x32xi32>
    %5 = arith.sitofp %4 : vector<8x32xi32> to vector<8x32xf32>
    %c0_1 = arith.constant 0 : index
    %c0_2 = arith.constant 0 : index
    %6 = vector.load %arg2[%c0_1, %c0_2] : memref<32x128xf32, #tpu.memory_space<vmem>>, vector<32x128xf32>
    %cst = arith.constant dense<0.000000e+00> : vector<8x128xf32>
    %7 = tpu.matmul %5, %6, %cst {dimension_numbers = #tpu.dot_dimension_numbers<[1], [0], [0], [1], [0, 0, 1, 1], [], []>} : vector<8x32xf32>, vector<32x128xf32>, vector<8x128xf32> -> vector<8x128xf32>
    %c0_3 = arith.constant 0 : index
    %c0_4 = arith.constant 0 : index
    %8 = vector.load %arg3[%c0_3, %c0_4] : memref<8x128xf32, #tpu.memory_space<vmem>>, vector<8x128xf32>
    tpu.vector_store %arg3[%c0_3, %c0_4], %7 {strides = array<i32>} : memref<8x128xf32, #tpu.memory_space<vmem>>, vector<8x128xf32>,
    return
  }
  func.func @transform_0(%arg0: i32) -> (i32, i32) {
    %c0_i32 = arith.constant 0 : i32
    %c0_i32_0 = arith.constant 0 : i32
    return %arg0, %c0_i32 : i32, i32
  }
  func.func @transform_1(%arg0: i32) -> (i32, i32) {
    %c0_i32 = arith.constant 0 : i32
    %c0_i32_0 = arith.constant 0 : i32
    %c0_i32_1 = arith.constant 0 : i32
    return %c0_i32, %c0_i32_0 : i32, i32
  }
  func.func @transform_2(%arg0: i32) -> (i32, i32) {
    %c0_i32 = arith.constant 0 : i32
    %c0_i32_0 = arith.constant 0 : i32
    return %arg0, %c0_i32 : i32, i32
  }
}

</mosaic_0001>

<bundles_post_ra>
// kernel: tpu_custom_call.1
= control target key start
LH: loop header
LB: loop body
LE: loop exit
PB: predicated region body
PF: predicated region fallthrough
CT: control target
= control target key end

     0   :  { %7 = vsyncpa [#allocation3], 0  ;;  %s674_s0 = inlined_call_operand.vmem [shape: s32[16,1], index: 0, kind: input, shape index: {}]   ;;  %s675_s1 = inlined_call_operand.hbm [shape: f32[32,128], index: 1, kind: input, shape index: {}]   ;;  %s676_s2 = inlined_call_operand.hbm [shape: f32[16,128], index: 2, kind: output, shape index: {}]  }
   0x1   :  { %8 = vsyncpa [#allocation4], 0 }
   0x2   :  { %10 = vsyncpa [#allocation4 + $0x1], 0  ;;  %s539_s9 = smov 0   ;;  %s541_s10 = smov 0  }
   0x3   :  { %s543_s11 = smov 0   ;;  %s545_s12 = smov 0  }
   0x4 LB: > { %s560_s13 = sadd.s32 4294967295, %s514_s12   ;;  %s327_s14 = sadd.s32 4294967294, %s514_s12   ;;  %s514_s12 = sphi %s545_s12, %s692_s12   ;;  %s510_s11 = sphi %s543_s11, %s691_s11   ;;  %s506_s10 = sphi %s541_s10, %s690_s10   ;;  %s502_s9 = sphi %s539_s9, %s689_s9  }
   0x5   : > { %s564_s15 = sadd.s32 1, %s514_s12   ;;  %s70_s16 = sadd.s32 1, %s510_s11 }
   0x6   : > { %s67_s17 = ssub.s32 %s514_s12, %s564_s15  ;;  %p80_p0 = scmp.ne.s32.totalorder %s510_s11, %s506_s10 }
   0x7   : > { %p68_p1 = scmp.eq.s32.totalorder %s67_s17, 0  ;;  %p81_p2 = scmp.eq.s32.totalorder %s560_s13, 1 }
   0x8   : > { %p86_p3 = scmp.ne.s32.totalorder %s506_s10, %s502_s9  ;;  %p87_p4 = scmp.eq.s32.totalorder %s327_s14, 1 }
   0x9   : > { %s575_s18 = scalar_select %p68_p1, %s510_s11, %s70_s16  }
   0xa   : > { %p577_p5 = por %p81_p2, %p80_p0  ;;  %p581_p6 = por %p87_p4, %p86_p3 }
   0xb   : > { %p328_p7 = scmp.ge.s32.totalorder %s514_s12, 1  ;;  %p94_p8 = scmp.lt.s32.totalorder %s514_s12, 3 }
   0xc   : > { %s680_s19 = scalar_select %p577_p5, 1, 0 }
   0xd   : > { %s681_s20 = scalar_select %p581_p6, 1, 0 }
   0xe   : > { %p677_p9 = scmp.eq.s32.totalorder %s560_s13, 0  ;;  %p588_p10 = pnand %p328_p7, %p94_p8 }
   0xf   : > { %s516_s22 = smov [#allocation2]   ;;  %s420_s27 = scalar_lea.hbm %s675_s1, 512 }
  0x10   : > { %s682_s21 = scalar_select %p588_p10, 1, 0 }
  0x11   : > { %s106_s23 = sshll.u32 %s516_s22, 4  ;;  %p369_p11 = pneg %p588_p10  ;;  %s107_s23 = int_to_ptr.vmem [resolvable:$true] %s106_s23 }
  0x12   : > { %p421_p13 = scmp.ne.s32.totalorder %s675_s1, %s420_s27  ;;  %p427_p3 = scmp.lt.u32.totalorder %s420_s27, %s675_s1 }
  0x13   : > { %p596_p12 = pnand %p677_p9, %p369_p11 }
  0x15   : > { %p422_p0 = pneg %p596_p12 }
  0x17   : > { %p423_p1 = pnand %p422_p0, %p421_p13 }
  0x19   : > { %p424_p2 = pneg %p423_p1 }
  0x1b   : > { %p429_p4 = pnand %p427_p3, %p424_p2 }
  0x1d   : > { %432 = shalt.err (!%p429_p4)
}
  0x1e   : > { %s433_s4 = scalar_lea.vmem %s107_s23, 512  ;;  %p441_p9 = scmp.lt.s32.totalorder %s107_s23, %s107_s23 }
  0x1f   : > { %p434_p7 = scmp.ne.s32.totalorder %s107_s23, %s433_s4  ;;  %p442_p6 = scmp.lt.s32.totalorder %s433_s4, %s433_s4 }
  0x21   : > { %p436_p8 = pnand %p434_p7, %p422_p0  ;;  %p443_p5 = por %p442_p6, %p441_p9 }
  0x23   : > { %p437_p11 = pneg %p436_p8 }
  0x25   : > { %p444_p10 = pnand %p443_p5, %p437_p11 }
  0x27   : > { %447 = shalt.err (!%p444_p10)
}
  0x28   : > { %s517_s5 = smov 128   ;;  %s518_s6 = smov 8  }
  0x29   : > { %372 = dma.hbm_to_vmem [thread:$0]  (!%p596_p12), %s675_s1, 512, %s107_s23, [#allocation3], %s517_s5, %s517_s5, %s518_s6  }
  0x2a   : > { %p684_p13 = scmp.ne.s32.totalorder %s682_s21, 0 }
  0x2b   : > { %p685_p1 = scmp.eq.s32.totalorder (!%p684_p13), %s560_s13, 0 }
  0x2c   : > { %129 = sbr.rel (%p684_p13) target bundleno = 415 (0x19f), region = 28 }
  0x33   : > { %493 = dma.done.wait (%p685_p1), [#allocation3], 512   ;;  %p686_p0 = pmov %p685_p1 }
  0x34   : > { %p150_p5 = scmp.lt.s32.totalorder %s560_s13, 1  ;;  %v519_v0 = vmov 0   ;;  %v520_v1 = vmov 0.0|0.0   ;;  %v163_v3 = vld [vmem:[#allocation2] sm:$0xff]  ;;  %v164_v4 = vld [vmem:[#allocation2 + $0x8] sm:$0xff]  ;;  %v165_v6 = vld [vmem:[#allocation2 + $0x10] sm:$0xff]  ;;  %v155_v10 = vlaneseq }
  0x35   : > { %495 = vsyncadd (%p686_p0), [#allocation3], 4294966784  ;;  %419 = vset.pattern.permute.xlu0 %v519_v0  ;;  %357 = vmatprep.subr.bf16.mxu0 %v520_v1  ;;  %v358_v5 = vpack.c.bf16 %v164_v4, %v163_v3  ;;  %v166_v7 = vld [vmem:[#allocation2 + $0x18] sm:$0xff]  ;;  %vm521_vm0 = vmmov 0   ;;  %v522_v8 = vmov 0.0   ;;  %vm167_vm1 = vcmask 261120  }
  0x36   : > { %s151_s14 = scalar_select %p150_p5, %s560_s13, 1  ;;  %354 = vmatprep.mubr.msk.f32.mxu0 %vm521_vm0, %v522_v8  ;;  %v361_v9 = vpack.c.bf16 %v166_v7, %v165_v6  ;;  %v156_v11 = vand.u32 127, %v155_v10 }
  0x37   : > { %359 = vmatpush3.bf16.msra.mxu0 %v358_v5  ;;  %s147_s23 = sand.u32 1, %s506_s10   ;;  %s338_s27 = sshll.u32 %s560_s13, 7 }
  0x38   : > { %s334_s16 = sshll.u32 %s151_s14, 3  ;;  %360 = vmatprep.subr.bf16.mxu0 %v520_v1  ;;  %s333_s24 = sshll.u32 %s147_s23, 3 }
  0x39   : > { %s153_s21 = scalar_lea.vmem %s674_s0, %s334_s16  ;;  %s149_s25 = scalar_lea.vmem [#allocation5], %s333_s24 }
  0x3a   : > { %v154_v2 = vld [vmem:[%s153_s21] sm:$0xff]  ;;  %s256_s26 = sshll.u32 %s149_s25, 4  ;;  %s634_s30 = scalar_lea.hbm %s676_s2, %s338_s27  ;;  %s629_s26 = int_to_ptr.vmem [resolvable:$true] %s256_s26 }
  0x3b   : > { %158 = vperm.xlu0 %419, %v154_v2   ;;  %362 = vmatpush3.bf16.msra.mxu0 %v361_v9  ;;  %s243_s3 = scalar_lea.sflag [#allocation4], %s147_s23  ;;  %s448_s4 = scalar_lea.vmem %s629_s26, 128 }
  0x3c   : > { %p449_p6 = scmp.ne.s32.totalorder %s629_s26, %s448_s4  ;;  %p687_p9 = scmp.ne.s32.totalorder %s680_s19, 0 }
  0x3d   : > { %s523_s13 = smov [#allocation5]  }
  0x3e   : > { %p450_p10 = pnand %p449_p6, %p687_p9  ;;  %s452_s5 = sshll.u32 %s523_s13, 4  ;;  %s453_s5 = int_to_ptr.vmem [resolvable:$false] %s452_s5 }
  0x3f   : > { %s454_s6 = scalar_lea.vmem %s453_s5, 256  ;;  %p455_p2 = scmp.lt.s32.totalorder %s629_s26, %s453_s5 }
  0x40   : > { %p451_p12 = pneg %p450_p10  ;;  %p456_p3 = scmp.lt.s32.totalorder %s454_s6, %s448_s4 }
  0x42   : > { %p457_p4 = por %p456_p3, %p455_p2 }
  0x44   : > { %p458_p7 = pnand %p457_p4, %p451_p12 }
  0xba   : > { %v159_v12 = vpop.permute.xlu0 %158 }
  0xbb   : > { %vm160_vm2 = vcmp.eq.s32.totalorder %v159_v12, %v156_v11 }
  0xbc   : > { %v335_v13 = vsel %vm160_vm2, 1.0, %v522_v8 }
  0xbd   : > { %355 = vmatmul.mubr.msk.f32.vlgmr.msra.gmra.mrb[0].mxu0 %vm167_vm1, %v335_v13 }
 0x190   : > { %v237_v14 = vpop.f32.mrb[0].mxu0 }
 0x191   : > { %241 = vst [vmem:[%s149_s25] sm:$0xff] %v237_v14  ;;  %v356_v15 = vpop.f32.mrb[1].mxu0 }
 0x192   : > { %461 = shalt.err (!%p458_p7)
}
 0x193   : > { %s462_s7 = scalar_lea.hbm %s634_s30, 128  ;;  %s466_s16 = scalar_lea.hbm %s676_s2, 256 }
 0x194   : > { %p463_p8 = scmp.ne.s32.totalorder %s634_s30, %s462_s7  ;;  %p467_p1 = scmp.lt.u32.totalorder %s634_s30, %s676_s2 }
 0x195   : > { %p468_p0 = scmp.lt.u32.totalorder %s466_s16, %s462_s7  ;;  %p470_p6 = scmp.lt.u32.totalorder %s462_s7, %s634_s30 }
 0x196   : > { %p464_p11 = pnand %p463_p8, %p687_p9 }
 0x197   : > { %p469_p5 = por %p468_p0, %p467_p1 }
 0x198   : > { %p465_p13 = pneg %p464_p11 }
 0x199   : > { %p471_p10 = por %p470_p6, %p469_p5 }
 0x19b   : > { %p472_p12 = pnand %p471_p10, %p465_p13 }
 0x19d   : > { %475 = shalt.err (!%p472_p12)
}
 0x19e   : > { %367 = dma.vmem_to_hbm [thread:$0]  (%p687_p9), %s629_s26, 128, %s634_s30, %s243_s3  }
 0x19f PF: > { %p379_p2 = scmp.ge.s32.totalorder %s514_s12, 2  ;;  %s268_s21 = sand.u32 1, %s502_s9  }
 0x1a0   : > { %p688_p3 = scmp.ne.s32.totalorder %s681_s20, 0  ;;  %s269_s23 = scalar_lea.sflag [#allocation4], %s268_s21 }
 0x1a2   : > { %p374_p4 = pnand %p379_p2, %p688_p3 }
 0x1a4   : > { %497 = dma.done.wait (!%p374_p4), %s269_s23, 128  }
 0x1a5   : > { %499 = vsyncadd (!%p374_p4), %s269_s23, 4294967168  ;;  %p13_p7 = scmp.ge.s32.totalorder %s564_s15, 4   ;;  %s689_s9 = smov %s506_s10 }
 0x1a6   : > { %s690_s10 = smov %s510_s11  ;;  %s691_s11 = smov %s575_s18 }
 0x1a7   : > { %s692_s12 = smov %s564_s15  ;;  %15 = sbr.rel (!%p13_p7) target bundleno = 4 (0x4), region = 68 }
 0x1ae   :  { %274 = vsyncpa [#allocation3], 1 }
 0x1af   :  { %276 = vsyncpa [#allocation3 + $0x1], 1 }
 0x1b0   :  { %277 = vsyncpa [#allocation4], 1 }
 0x1b1   :  { %279 = vsyncpa [#allocation4 + $0x1], 1 }

// kernel: tpu_custom_call.1
= control target key start
LH: loop header
LB: loop body
LE: loop exit
PB: predicated region body
PF: predicated region fallthrough
CT: control target
= control target key end

     0   :  { %7 = vsyncpa [#allocation3], 0  ;;  %s674_s0 = inlined_call_operand.vmem [shape: s32[16,1], index: 0, kind: input, shape index: {}]   ;;  %s675_s1 = inlined_call_operand.hbm [shape: f32[32,128], index: 1, kind: input, shape index: {}]   ;;  %s676_s2 = inlined_call_operand.hbm [shape: f32[16,128], index: 2, kind: output, shape index: {}]  }
   0x1   :  { %8 = vsyncpa [#allocation4], 0 }
   0x2   :  { %10 = vsyncpa [#allocation4 + $0x1], 0  ;;  %s539_s9 = smov 0   ;;  %s541_s10 = smov 0  }
   0x3   :  { %s543_s11 = smov 0   ;;  %s545_s12 = smov 0  }
   0x4 LB: > { %s560_s13 = sadd.s32 4294967295, %s514_s12   ;;  %s327_s14 = sadd.s32 4294967294, %s514_s12   ;;  %s514_s12 = sphi %s545_s12, %s692_s12   ;;  %s510_s11 = sphi %s543_s11, %s691_s11   ;;  %s506_s10 = sphi %s541_s10, %s690_s10   ;;  %s502_s9 = sphi %s539_s9, %s689_s9  }
   0x5   : > { %s564_s15 = sadd.s32 1, %s514_s12   ;;  %s70_s16 = sadd.s32 1, %s510_s11 }
   0x6   : > { %s67_s17 = ssub.s32 %s514_s12, %s564_s15  ;;  %p80_p0 = scmp.ne.s32.totalorder %s510_s11, %s506_s10 }
   0x7   : > { %p68_p1 = scmp.eq.s32.totalorder %s67_s17, 0  ;;  %p81_p2 = scmp.eq.s32.totalorder %s560_s13, 1 }
   0x8   : > { %p86_p3 = scmp.ne.s32.totalorder %s506_s10, %s502_s9  ;;  %p87_p4 = scmp.eq.s32.totalorder %s327_s14, 1 }
   0x9   : > { %s575_s18 = scalar_select %p68_p1, %s510_s11, %s70_s16  }
   0xa   : > { %p577_p5 = por %p81_p2, %p80_p0  ;;  %p581_p6 = por %p87_p4, %p86_p3 }
   0xb   : > { %p328_p7 = scmp.ge.s32.totalorder %s514_s12, 1  ;;  %p94_p8 = scmp.lt.s32.totalorder %s514_s12, 3 }
   0xc   : > { %s680_s19 = scalar_select %p577_p5, 1, 0 }
   0xd   : > { %s681_s20 = scalar_select %p581_p6, 1, 0 }
   0xe   : > { %p677_p9 = scmp.eq.s32.totalorder %s560_s13, 0  ;;  %p588_p10 = pnand %p328_p7, %p94_p8 }
   0xf   : > { %s516_s22 = smov [#allocation2]   ;;  %s420_s27 = scalar_lea.hbm %s675_s1, 512 }
  0x10   : > { %s682_s21 = scalar_select %p588_p10, 1, 0 }
  0x11   : > { %s106_s23 = sshll.u32 %s516_s22, 4  ;;  %p369_p11 = pneg %p588_p10  ;;  %s107_s23 = int_to_ptr.vmem [resolvable:$true] %s106_s23 }
  0x12   : > { %p421_p13 = scmp.ne.s32.totalorder %s675_s1, %s420_s27  ;;  %p427_p3 = scmp.lt.u32.totalorder %s420_s27, %s675_s1 }
  0x13   : > { %p596_p12 = pnand %p677_p9, %p369_p11 }
  0x15   : > { %p422_p0 = pneg %p596_p12 }
  0x17   : > { %p423_p1 = pnand %p422_p0, %p421_p13 }
  0x19   : > { %p424_p2 = pneg %p423_p1 }
  0x1b   : > { %p429_p4 = pnand %p427_p3, %p424_p2 }
  0x1d   : > { %432 = shalt.err (!%p429_p4)
}
  0x1e   : > { %s433_s4 = scalar_lea.vmem %s107_s23, 512  ;;  %p441_p9 = scmp.lt.s32.totalorder %s107_s23, %s107_s23 }
  0x1f   : > { %p434_p7 = scmp.ne.s32.totalorder %s107_s23, %s433_s4  ;;  %p442_p6 = scmp.lt.s32.totalorder %s433_s4, %s433_s4 }
  0x21   : > { %p436_p8 = pnand %p434_p7, %p422_p0  ;;  %p443_p5 = por %p442_p6, %p441_p9 }
  0x23   : > { %p437_p11 = pneg %p436_p8 }
  0x25   : > { %p444_p10 = pnand %p443_p5, %p437_p11 }
  0x27   : > { %447 = shalt.err (!%p444_p10)
}
  0x28   : > { %s517_s5 = smov 128   ;;  %s518_s6 = smov 8  }
  0x29   : > { %372 = dma.hbm_to_vmem [thread:$0]  (!%p596_p12), %s675_s1, 512, %s107_s23, [#allocation3], %s517_s5, %s517_s5, %s518_s6  }
  0x2a   : > { %p684_p13 = scmp.ne.s32.totalorder %s682_s21, 0 }
  0x2b   : > { %p685_p1 = scmp.eq.s32.totalorder (!%p684_p13), %s560_s13, 0 }
  0x2c   : > { %129 = sbr.rel (%p684_p13) target bundleno = 415 (0x19f), region = 28 }
  0x33   : > { %493 = dma.done.wait (%p685_p1), [#allocation3], 512   ;;  %p686_p0 = pmov %p685_p1 }
  0x34   : > { %p150_p5 = scmp.lt.s32.totalorder %s560_s13, 1  ;;  %v519_v0 = vmov 0   ;;  %v520_v1 = vmov 0.0|0.0   ;;  %v163_v3 = vld [vmem:[#allocation2] sm:$0xff]  ;;  %v164_v4 = vld [vmem:[#allocation2 + $0x8] sm:$0xff]  ;;  %v165_v6 = vld [vmem:[#allocation2 + $0x10] sm:$0xff]  ;;  %v155_v10 = vlaneseq }
  0x35   : > { %495 = vsyncadd (%p686_p0), [#allocation3], 4294966784  ;;  %419 = vset.pattern.permute.xlu0 %v519_v0  ;;  %357 = vmatprep.subr.bf16.mxu0 %v520_v1  ;;  %v358_v5 = vpack.c.bf16 %v164_v4, %v163_v3  ;;  %v166_v7 = vld [vmem:[#allocation2 + $0x18] sm:$0xff]  ;;  %vm521_vm0 = vmmov 0   ;;  %v522_v8 = vmov 0.0   ;;  %vm167_vm1 = vcmask 261120  }
  0x36   : > { %s151_s14 = scalar_select %p150_p5, %s560_s13, 1  ;;  %354 = vmatprep.mubr.msk.f32.mxu0 %vm521_vm0, %v522_v8  ;;  %v361_v9 = vpack.c.bf16 %v166_v7, %v165_v6  ;;  %v156_v11 = vand.u32 127, %v155_v10 }
  0x37   : > { %359 = vmatpush3.bf16.msra.mxu0 %v358_v5  ;;  %s147_s23 = sand.u32 1, %s506_s10   ;;  %s338_s27 = sshll.u32 %s560_s13, 7 }
  0x38   : > { %s334_s16 = sshll.u32 %s151_s14, 3  ;;  %360 = vmatprep.subr.bf16.mxu0 %v520_v1  ;;  %s333_s24 = sshll.u32 %s147_s23, 3 }
  0x39   : > { %s153_s21 = scalar_lea.vmem %s674_s0, %s334_s16  ;;  %s149_s25 = scalar_lea.vmem [#allocation5], %s333_s24 }
  0x3a   : > { %v154_v2 = vld [vmem:[%s153_s21] sm:$0xff]  ;;  %s256_s26 = sshll.u32 %s149_s25, 4  ;;  %s634_s30 = scalar_lea.hbm %s676_s2, %s338_s27  ;;  %s629_s26 = int_to_ptr.vmem [resolvable:$true] %s256_s26 }
  0x3b   : > { %158 = vperm.xlu0 %419, %v154_v2   ;;  %362 = vmatpush3.bf16.msra.mxu0 %v361_v9  ;;  %s243_s3 = scalar_lea.sflag [#allocation4], %s147_s23  ;;  %s448_s4 = scalar_lea.vmem %s629_s26, 128 }
  0x3c   : > { %p449_p6 = scmp.ne.s32.totalorder %s629_s26, %s448_s4  ;;  %p687_p9 = scmp.ne.s32.totalorder %s680_s19, 0 }
  0x3d   : > { %s523_s13 = smov [#allocation5]  }
  0x3e   : > { %p450_p10 = pnand %p449_p6, %p687_p9  ;;  %s452_s5 = sshll.u32 %s523_s13, 4  ;;  %s453_s5 = int_to_ptr.vmem [resolvable:$false] %s452_s5 }
  0x3f   : > { %s454_s6 = scalar_lea.vmem %s453_s5, 256  ;;  %p455_p2 = scmp.lt.s32.totalorder %s629_s26, %s453_s5 }
  0x40   : > { %p451_p12 = pneg %p450_p10  ;;  %p456_p3 = scmp.lt.s32.totalorder %s454_s6, %s448_s4 }
  0x42   : > { %p457_p4 = por %p456_p3, %p455_p2 }
  0x44   : > { %p458_p7 = pnand %p457_p4, %p451_p12 }
  0xba   : > { %v159_v12 = vpop.permute.xlu0 %158 }
  0xbb   : > { %vm160_vm2 = vcmp.eq.s32.totalorder %v159_v12, %v156_v11 }
  0xbc   : > { %v335_v13 = vsel %vm160_vm2, 1.0, %v522_v8 }
  0xbd   : > { %355 = vmatmul.mubr.msk.f32.vlgmr.msra.gmra.mrb[0].mxu0 %vm167_vm1, %v335_v13 }
 0x190   : > { %v237_v14 = vpop.f32.mrb[0].mxu0 }
 0x191   : > { %241 = vst [vmem:[%s149_s25] sm:$0xff] %v237_v14  ;;  %v356_v15 = vpop.f32.mrb[1].mxu0 }
 0x192   : > { %461 = shalt.err (!%p458_p7)
}
 0x193   : > { %s462_s7 = scalar_lea.hbm %s634_s30, 128  ;;  %s466_s16 = scalar_lea.hbm %s676_s2, 256 }
 0x194   : > { %p463_p8 = scmp.ne.s32.totalorder %s634_s30, %s462_s7  ;;  %p467_p1 = scmp.lt.u32.totalorder %s634_s30, %s676_s2 }
 0x195   : > { %p468_p0 = scmp.lt.u32.totalorder %s466_s16, %s462_s7  ;;  %p470_p6 = scmp.lt.u32.totalorder %s462_s7, %s634_s30 }
 0x196   : > { %p464_p11 = pnand %p463_p8, %p687_p9 }
 0x197   : > { %p469_p5 = por %p468_p0, %p467_p1 }
 0x198   : > { %p465_p13 = pneg %p464_p11 }
 0x199   : > { %p471_p10 = por %p470_p6, %p469_p5 }
 0x19b   : > { %p472_p12 = pnand %p471_p10, %p465_p13 }
 0x19d   : > { %475 = shalt.err (!%p472_p12)
}
 0x19e   : > { %367 = dma.vmem_to_hbm [thread:$0]  (%p687_p9), %s629_s26, 128, %s634_s30, %s243_s3  }
 0x19f PF: > { %p379_p2 = scmp.ge.s32.totalorder %s514_s12, 2  ;;  %s268_s21 = sand.u32 1, %s502_s9  }
 0x1a0   : > { %p688_p3 = scmp.ne.s32.totalorder %s681_s20, 0  ;;  %s269_s23 = scalar_lea.sflag [#allocation4], %s268_s21 }
 0x1a2   : > { %p374_p4 = pnand %p379_p2, %p688_p3 }
 0x1a4   : > { %497 = dma.done.wait (!%p374_p4), %s269_s23, 128  }
 0x1a5   : > { %499 = vsyncadd (!%p374_p4), %s269_s23, 4294967168  ;;  %p13_p7 = scmp.ge.s32.totalorder %s564_s15, 4   ;;  %s689_s9 = smov %s506_s10 }
 0x1a6   : > { %s690_s10 = smov %s510_s11  ;;  %s691_s11 = smov %s575_s18 }
 0x1a7   : > { %s692_s12 = smov %s564_s15  ;;  %15 = sbr.rel (!%p13_p7) target bundleno = 4 (0x4), region = 68 }
 0x1ae   :  { %274 = vsyncpa [#allocation3], 1 }
 0x1af   :  { %276 = vsyncpa [#allocation3 + $0x1], 1 }
 0x1b0   :  { %277 = vsyncpa [#allocation4], 1 }
 0x1b1   :  { %279 = vsyncpa [#allocation4 + $0x1], 1 }

</bundles_post_ra>
